<compile_context>
chip_gen: v6e
topology: v6e:2x2x1
jax: 0.10.0
libtpu: 0.0.40
codegen_flags: <defaults>
</compile_context>

<pallas_src>
import math

import jax
import jax.numpy as jnp
from jax.experimental import pallas as pl
from jax.experimental.pallas import tpu as pltpu


def _round_up(x: int, m: int) -> int:
    return ((x + m - 1) // m) * m


def _sinusoidal_kernel(time_ref, fp_ref, out_ref):
    """time_ref: (TB, 1) f32; fp_ref: (2, dim_p) f32 (row 0 = freqs, row 1 = phase);
    out_ref: (TB, dim_p) out_dtype."""
    t = time_ref[...]                       # (TB, 1)
    freqs = fp_ref[0:1, :]                  # (1, dim_p)
    phase = fp_ref[1:2, :]                  # (1, dim_p)
    # One multiply, one add, one sin per output element (cos via phase shift).
    out_ref[...] = jnp.sin(t * freqs + phase).astype(out_ref.dtype)


def sinusoidal_position_embeddings(
    time: jax.Array,
    dim: int,
    *,
    out_dtype=jnp.float32,
    block_rows: int = 2048,
) -> jax.Array:
    """Equivalent of SinusoidalPositionEmbeddings(dim)(time). time: (B,)."""
    assert time.ndim == 1, "time is expected to be a 1-D tensor of timesteps"
    assert dim % 2 == 0, "dim must be even (module interleaves sin/cos pairs)"
    assert dim >= 4, "dim must be >= 4 (half_dim - 1 would divide by zero)"

    B = time.shape[0]
    half_dim = dim // 2
    scale = math.log(10000.0) / (half_dim - 1)

    # Lane-dense output width (pad to a multiple of 128, slice afterwards).
    # Typical diffusion embedding widths (128/256/512) need no padding.
    dim_p = _round_up(dim, 128)

    # Trace-time constants of `dim` only (no per-row transcendental setup in-kernel):
    #   column 2k   -> freq exp(-k*scale), phase 0      (sin)
    #   column 2k+1 -> freq exp(-k*scale), phase pi/2   (cos via sin(x + pi/2))
    freqs_half = jnp.exp(-scale * jnp.arange(half_dim, dtype=jnp.float32))  # (half_dim,)
    freqs = jnp.repeat(freqs_half, 2)                                        # (dim,)
    phase = jnp.tile(jnp.array([0.0, math.pi / 2.0], dtype=jnp.float32), half_dim)
    if dim_p != dim:
        pad = dim_p - dim
        freqs = jnp.concatenate([freqs, jnp.zeros((pad,), jnp.float32)])
        phase = jnp.concatenate([phase, jnp.zeros((pad,), jnp.float32)])
    freq_phase = jnp.stack([freqs, phase], axis=0)                           # (2, dim_p)

    time2d = time.astype(jnp.float32).reshape(B, 1)

    # Batch tiling:
    #  * B <= 8: one full-array block (cannot split below the 8-sublane granule).
    #  * B  > 8: at least 2 grid steps (megacore sharding on v7x), rows per
    #    step a multiple of 8, capped at block_rows; partial last block is
    #    handled by Pallas (masked boundary writes).
    if B <= 8:
        TB = B
    else:
        TB = max(8, min(block_rows, _round_up(pl.cdiv(B, 2), 8)))
    grid = (pl.cdiv(B, TB),)

    out_padded = pl.pallas_call(
        _sinusoidal_kernel,
        out_shape=jax.ShapeDtypeStruct((B, dim_p), out_dtype),
        grid=grid,
        in_specs=[
            pl.BlockSpec((TB, 1), lambda i: (i, 0)),       # per-block timesteps
            pl.BlockSpec((2, dim_p), lambda i: (0, 0)),    # resident freqs+phase
        ],
        out_specs=pl.BlockSpec((TB, dim_p), lambda i: (i, 0)),
        compiler_params=pltpu.CompilerParams(
            # Batch axis is embarrassingly parallel: shards across both
            # TensorCores on v7x, no-op on v5e/v6e.
            dimension_semantics=("parallel",),
        ),
    )(time2d, freq_phase)

    if dim_p != dim:
        out_padded = out_padded[:, :dim]
    return out_padded


def _reference(time: jax.Array, dim: int) -> jax.Array:
    """Pure-JAX reference mirroring the PyTorch forward (stack + flatten)."""
    half_dim = dim // 2
    scale = math.log(10000.0) / (half_dim - 1)
    freqs = jnp.exp(jnp.arange(half_dim, dtype=jnp.float32) * -scale)
    args = time.astype(jnp.float32)[:, None] * freqs[None, :]               # (B, half_dim)
    return jnp.stack((jnp.sin(args), jnp.cos(args)), axis=-1).reshape(time.shape[0], dim)


if __name__ == "__main__":
    # Small, module-consistent shapes. B=16 exercises the >=2-grid-step path
    # (two 8-row blocks -> megacore sharding on v7x); dim=128 is lane-dense.
    B, DIM = 16, 128

    key = jax.random.PRNGKey(0)
    # Diffusion-style timesteps in [0, 1000) as floats.
    time = jax.random.uniform(key, (B,), dtype=jnp.float32, minval=0.0, maxval=1000.0)

    out = sinusoidal_position_embeddings(time, DIM)
    out = jax.block_until_ready(out)

    ref = _reference(time, DIM)
    assert out.shape == (B, DIM) and out.dtype == jnp.float32
    # Tolerance note: cos(x) = sin(x + pi/2). For arguments up to ~1e3 the f32
    # rounding of (x + pi/2) perturbs the argument by ~0.5 ulp(1e3) ~= 3e-5, so
    # odd columns can differ from a direct cos() by O(1e-4) absolute.
    assert jnp.allclose(out, ref, atol=5e-4, rtol=5e-4), "mismatch vs reference"

    print("KERNEL_OK")
</pallas_src>

<mosaic_0001>
module attributes {stable_mosaic.version = 11 : i64} {
  func.func @_sinusoidal_kernel(%arg0: i32, %arg1: memref<8x1xf32, #tpu.memory_space<vmem>>, %arg2: memref<2x128xf32, #tpu.memory_space<vmem>>, %arg3: memref<8x128xf32, #tpu.memory_space<vmem>>) attributes {dimension_semantics = [#tpu.dimension_semantics<parallel>], iteration_bounds = array<i64: 2>, scalar_prefetch = 0 : i64, scratch_operands = 0 : i64, tpu.core_type = #tpu.core_type<tc>, window_params = [{transform_indices = @transform_0, window_bounds = array<i64: 8, 1>}, {pipeline_mode = #tpu.pipeline_mode<synchronous>, transform_indices = @transform_1, window_bounds = array<i64: 2, 128>}, {transform_indices = @transform_2, window_bounds = array<i64: 8, 128>}]} {
    %c0 = arith.constant 0 : index
    %c0_0 = arith.constant 0 : index
    %0 = vector.load %arg1[%c0, %c0_0] : memref<8x1xf32, #tpu.memory_space<vmem>>, vector<8x1xf32>
    %c0_1 = arith.constant 0 : index
    %c0_2 = arith.constant 0 : index
    %1 = vector.load %arg2[%c0_1, %c0_2] : memref<2x128xf32, #tpu.memory_space<vmem>>, vector<1x128xf32>
    %c1 = arith.constant 1 : index
    %c0_3 = arith.constant 0 : index
    %2 = vector.load %arg2[%c1, %c0_3] : memref<2x128xf32, #tpu.memory_space<vmem>>, vector<1x128xf32>
    %3 = vector.broadcast %0 : vector<8x1xf32> to vector<8x128xf32>
    %4 = vector.broadcast %1 : vector<1x128xf32> to vector<8x128xf32>
    %5 = arith.mulf %3, %4 : vector<8x128xf32>
    %6 = vector.broadcast %2 : vector<1x128xf32> to vector<8x128xf32>
    %7 = arith.addf %5, %6 : vector<8x128xf32>
    %8 = math.sin %7 : vector<8x128xf32>
    %c0_4 = arith.constant 0 : index
    %c0_5 = arith.constant 0 : index
    %9 = vector.load %arg3[%c0_4, %c0_5] : memref<8x128xf32, #tpu.memory_space<vmem>>, vector<8x128xf32>
    tpu.vector_store %arg3[%c0_4, %c0_5], %8 {strides = array<i32>} : memref<8x128xf32, #tpu.memory_space<vmem>>, vector<8x128xf32>,
    return
  }
  func.func @transform_0(%arg0: i32) -> (i32, i32) {
    %c0_i32 = arith.constant 0 : i32
    %c0_i32_0 = arith.constant 0 : i32
    return %arg0, %c0_i32 : i32, i32
  }
  func.func @transform_1(%arg0: i32) -> (i32, i32) {
    %c0_i32 = arith.constant 0 : i32
    %c0_i32_0 = arith.constant 0 : i32
    %c0_i32_1 = arith.constant 0 : i32
    return %c0_i32, %c0_i32_0 : i32, i32
  }
  func.func @transform_2(%arg0: i32) -> (i32, i32) {
    %c0_i32 = arith.constant 0 : i32
    %c0_i32_0 = arith.constant 0 : i32
    return %arg0, %c0_i32 : i32, i32
  }
}

</mosaic_0001>

<bundles_post_ra>
// kernel: tpu_custom_call.1
= control target key start
LH: loop header
LB: loop body
LE: loop exit
PB: predicated region body
PF: predicated region fallthrough
CT: control target
= control target key end

     0   :  { %7 = vsyncpa [#allocation3], 0  ;;  %s611_s0 = inlined_call_operand.vmem [shape: f32[16,1], index: 0, kind: input, shape index: {}]   ;;  %s612_s1 = inlined_call_operand.vmem [shape: f32[2,128], index: 1, kind: input, shape index: {}]   ;;  %s613_s2 = inlined_call_operand.hbm [shape: f32[16,128], index: 2, kind: output, shape index: {}]  }
   0x1   :  { %9 = vsyncpa [#allocation3 + $0x1], 0  ;;  %s491_s9 = smov 0   ;;  %s493_s10 = smov 0  }
   0x2   :  { %s495_s11 = smov 0   ;;  %s497_s12 = smov 0  }
   0x3 LB: > { %s512_s13 = sadd.s32 4294967295, %s466_s12   ;;  %s335_s14 = sadd.s32 4294967294, %s466_s12   ;;  %s466_s12 = sphi %s497_s12, %s619_s12   ;;  %s462_s11 = sphi %s495_s11, %s618_s11   ;;  %s458_s10 = sphi %s493_s10, %s617_s10   ;;  %s454_s9 = sphi %s491_s9, %s616_s9  }
   0x4   : > { %s516_s15 = sadd.s32 1, %s466_s12   ;;  %s69_s16 = sadd.s32 1, %s462_s11 }
   0x5   : > { %s66_s17 = ssub.s32 %s466_s12, %s516_s15  ;;  %p79_p0 = scmp.ne.s32.totalorder %s462_s11, %s458_s10 }
   0x6   : > { %p67_p1 = scmp.eq.s32.totalorder %s66_s17, 0  ;;  %p80_p2 = scmp.eq.s32.totalorder %s512_s13, 1 }
   0x7   : > { %p85_p3 = scmp.ne.s32.totalorder %s458_s10, %s454_s9  ;;  %p86_p4 = scmp.eq.s32.totalorder %s335_s14, 1 }
   0x8   : > { %s527_s18 = scalar_select %p67_p1, %s462_s11, %s69_s16  }
   0x9   : > { %p529_p5 = por %p80_p2, %p79_p0  ;;  %p533_p6 = por %p86_p4, %p85_p3 }
   0xa   : > { %p338_p7 = scmp.ge.s32.totalorder %s466_s12, 1  ;;  %p114_p8 = scmp.lt.s32.totalorder %s466_s12, 3 }
   0xc   : > { %p115_p9 = pnand %p338_p7, %p114_p8 }
   0xd   : > { %p135_p10 = scmp.lt.s32.totalorder (!%p115_p9), %s512_s13, 1  ;;  %s132_s30 = sand.u32 (!%p115_p9), 1, %s458_s10  }
   0xe   : > { %118 = sbr.rel (%p115_p9) target bundleno = 247 (0xf7), region = 28  ;;  %s339_s3 = sshll.u32 (!%p115_p9), %s132_s30, 3 }
   0xf   : > { %s348_s4 = sshll.u32 (!%p115_p9), %s512_s13, 7  ;;  %s134_s5 = scalar_lea.vmem (!%p115_p9), [#allocation2], %s339_s3 }
  0x10   : > { %s276_s6 = sshll.u32 (!%p115_p9), %s134_s5, 4  ;;  %s576_s14 = scalar_lea.hbm (!%p115_p9), %s613_s2, %s348_s4  ;;  %s277_s6 = int_to_ptr.vmem [resolvable:$true] %s276_s6 }
  0x11   : > { %s263_s16 = scalar_lea.sflag (!%p115_p9), [#allocation3], %s132_s30  ;;  %s475_s17 = smov (!%p115_p9), [#allocation2]  }
  0x13   : > { %v468_v0 = vmov 0   ;;  %s136_s21 = scalar_select %p135_p10, %s512_s13, 1  ;;  %v341_v2 = vld [vmem:[%s612_s1] ss:$0 sm:$0xff]  ;;  %v342_v3 = vld [vmem:[%s612_s1 + $0x1] ss:$0 sm:$0xff] }
  0x14   : > { %401 = vset.pattern.permute.xlu0 %v468_v0  ;;  %v469_v17 = vmov 683565275   ;;  %v470_v19 = vmov 2475754826   ;;  %v471_v22 = vmov 2131351028  }
  0x15   : > { %s340_s22 = sshll.u32 %s136_s21, 3  ;;  %v472_v25 = vmov 2102212464   ;;  %v473_v28 = vmov 920167782   ;;  %s406_s13 = scalar_lea.vmem %s277_s6, 128 }
  0x16   : > { %s138_s25 = scalar_lea.vmem %s611_s0, %s340_s22  ;;  %v474_v31 = vmov 1326507024   ;;  %p407_p11 = scmp.ne.s32.totalorder %s277_s6, %s406_s13 }
  0x17   : > { %v139_v1 = vld [vmem:[%s138_s25] sm:$0xff]  ;;  %s410_s21 = sshll.u32 %s475_s17, 4  ;;  %s411_s21 = int_to_ptr.vmem [resolvable:$false] %s410_s21 }
  0x18   : > { %144 = vperm.xlu0 %401, %v139_v1   ;;  %p408_p12 = pnand %p407_p11, %p529_p5  ;;  %s412_s22 = scalar_lea.vmem %s411_s21, 256 }
  0x19   : > { %p413_p0 = scmp.lt.s32.totalorder %s277_s6, %s411_s21  ;;  %p414_p1 = scmp.lt.s32.totalorder %s412_s22, %s406_s13 }
  0x1a   : > { %p409_p13 = pneg %p408_p12 }
  0x1b   : > { %p415_p2 = por %p414_p1, %p413_p0 }
  0x1d   : > { %p416_p3 = pnand %p415_p2, %p409_p13 }
  0x93   : > { %v145_v4 = vpop.permute.xlu0 %144 }
  0x94   : > { %v151_v5 = vmul.f32 %v341_v2, %v145_v4 }
  0x96   : > { %v550_v6 = vadd.f32 %v342_v3, %v151_v5 }
  0x98   : > { %v160_v7 = vand.u32 2139095040, %v550_v6  ;;  %v157_v11 = vand.u32 2147483647, %v550_v6  ;;  %vm159_vm7 = vcmp.lt.s32.totalorder %v550_v6, 0  ;;  %vm249_vm12 = vweird.f32 %v550_v6 }
  0x9a   : > { %v161_v8 = vshrl.u32 %v160_v7, 23  ;;  %v164_v14 = vand.u32 8388607, %v157_v11  ;;  %vm158_vm8 = vcmp.le.f32.partialorder %v157_v11, 0.7853982 }
  0x9c   : > { %v343_v9 = vadd.s32 4294967169, %v161_v8  ;;  %v165_v33 = vor.u32 8388608, %v164_v14 }
  0x9e   : > { %v167_v10 = vadd.s32 1, %v343_v9  ;;  %v205_v47 = vshll.u32 %v165_v33, 8 }
  0xa0   : > { %vm168_vm0 = vcmp.gt.s32.totalorder %v167_v10, 0 }
  0xa1   : > { %v169_v12 = vsel %vm168_vm0, %v167_v10, 0 }
  0xa2   : > { %v171_v13 = vand.u32 31, %v169_v12  ;;  %v170_v16 = vshrl.u32 %v169_v12, 5 }
  0xa4   : > { %v172_v15 = vsub.s32 32, %v171_v13  ;;  %v174_v18 = vshll.u32 %v469_v17, %v171_v13  ;;  %v177_v20 = vshll.u32 %v470_v19, %v171_v13  ;;  %v180_v24 = vshll.u32 %v471_v22, %v171_v13 }
  0xa5   : > { %v183_v27 = vshll.u32 %v472_v25, %v171_v13  ;;  %v186_v30 = vshll.u32 %v473_v28, %v171_v13  ;;  %vm189_vm1 = vcmp.lt.s32.totalorder %v170_v16, 1  ;;  %vm192_vm2 = vcmp.lt.s32.totalorder %v170_v16, 4 }
  0xa6   : > { %v175_v21 = vshrl.u32 %v470_v19, %v172_v15  ;;  %v178_v23 = vshrl.u32 %v471_v22, %v172_v15  ;;  %v181_v26 = vshrl.u32 %v472_v25, %v172_v15  ;;  %v184_v29 = vshrl.u32 %v473_v28, %v172_v15 }
  0xa7   : > { %v187_v32 = vshrl.u32 %v474_v31, %v172_v15  ;;  %v173_v42 = vshrl.u32 %v469_v17, %v172_v15  ;;  %vm191_vm3 = vcmp.lt.s32.totalorder %v170_v16, 3  ;;  %vm190_vm4 = vcmp.lt.s32.totalorder %v170_v16, 2 }
  0xa8   : > { %v176_v34 = vor.u32 %v175_v21, %v174_v18  ;;  %v179_v35 = vor.u32 %v178_v23, %v177_v20  ;;  %v182_v36 = vor.u32 %v181_v26, %v180_v24  ;;  %v185_v37 = vor.u32 %v184_v29, %v183_v27 }
  0xa9   : > { %v188_v38 = vor.u32 %v187_v32, %v186_v30 }
  0xaa   : > { %v194_v39 = vsel %vm192_vm2, %v182_v36, 2102212464  ;;  %v197_v40 = vsel %vm189_vm1, %v176_v34, %v179_v35  ;;  %v201_v41 = vsel %vm189_vm1, %v179_v35, %v182_v36  ;;  %v198_v43 = vsel %vm192_vm2, %v185_v37, 920167782 }
  0xab   : > { %v202_v44 = vsel %vm192_vm2, %v188_v38, 1326507024  ;;  %v199_v45 = vsel %vm191_vm3, %v182_v36, %v198_v43  ;;  %v193_v48 = vsel %vm189_vm1, %v173_v42, %v176_v34  ;;  %v195_v49 = vsel %vm191_vm3, %v179_v35, %v194_v39 }
  0xac   : > { %v203_v46 = vsel %vm191_vm3, %v185_v37, %v202_v44  ;;  %v200_v50 = vsel %vm190_vm4, %v197_v40, %v199_v45  ;;  %v196_v56 = vsel %vm190_vm4, %v193_v48, %v195_v49 }
  0xad   : > { %v204_v51 = vsel %vm190_vm4, %v201_v41, %v203_v46  ;;  %v559_v54 = vmul.u32.u64.low %v205_v47, %v200_v50  ;;  %v560_v55 = vmul.u32.u64.high %v205_v47, %v200_v50, %v559_v54  ;;  %v212_v58 = vmul.u32 %v205_v47, %v196_v56 }
  0xae   : > { %v556_v52 = vmul.u32.u64.low %v205_v47, %v204_v51  ;;  %v557_v53 = vmul.u32.u64.high %v205_v47, %v204_v51, %v556_v52 }
  0xaf   : > { %v215_v57 = vadd.s32 1, %v560_v55 }
  0xb0   : > { %vm214_vm5 = vc.u32 %v557_v53, %v559_v54  ;;  %v213_v7 = vadd.s32 %v559_v54, %v557_v53 }
  0xb1   : > { %v216_v59 = vsel %vm214_vm5, %v215_v57, %v560_v55 }
  0xb2   : > { %v217_v60 = vadd.s32 %v216_v59, %v212_v58 }
  0xb4   : > { %v218_v61 = vadd.s32 536870912, %v217_v60 }
  0xb6   : > { %v219_v62 = vshrl.u32 %v218_v61, 30 }
  0xb8   : > { %v220_v63 = vshll.u32 %v219_v62, 30  ;;  %v243_v21 = vsub.s32 4, %v219_v62 }
  0xba   : > { %v221_v0 = vsub.s32 %v217_v60, %v220_v63  ;;  %v244_v24 = vsel %vm159_vm7, %v243_v21, %v219_v62 }
  0xbb   : > { %v246_v25 = vsel %vm158_vm8, 0, %v244_v24 }
  0xbc   : > { %v223_v1 = vsub.s32 0, %v221_v0  ;;  %v250_v26 = vadd.s32 3, %v246_v25 }
  0xbe   : > { %v344_v2 = vmin.u32 %v223_v1, %v221_v0  ;;  %v251_v27 = vand.u32 3, %v250_v26 }
  0xc0   : > { %v225_v3 = vclz %v344_v2  ;;  %vm256_vm9 = vcmp.eq.s32.totalorder %v251_v27, 2  ;;  %vm253_vm10 = vcmp.eq.s32.totalorder %v251_v27, 0  ;;  %vm252_vm11 = vcmp.lt.s32.totalorder %v251_v27, 2 }
  0xc2   : > { %v345_v4 = vadd.s32 4294967294, %v225_v3 }
  0xc4   : > { %vm346_vm6 = vcmp.lt.s32.totalorder %v345_v4, 0 }
  0xc5   : > { %v228_v5 = vsel %vm346_vm6, 0, %v345_v4 }
  0xc6   : > { %v229_v8 = vsub.s32 32, %v228_v5  ;;  %v233_v9 = vsub.s32 4294967266, %v228_v5  ;;  %v230_v10 = vshll.u32 %v221_v0, %v228_v5 }
  0xc8   : > { %v231_v12 = vshrl.u32 %v213_v7, %v229_v8  ;;  %v234_v13 = vadd.s32 127, %v233_v9 }
  0xca   : > { %v232_v14 = vor.u32 %v231_v12, %v230_v10  ;;  %v235_v15 = vshll.u32 %v234_v13, 23 }
  0xcc   : > { %v236_v16 = vor.u32 4788187, %v235_v15  ;;  %v239_v18 = vcvt.s32.f32 %v232_v14 }
  0xce   : > { %v237_v17 = vand.u32 2147483647, %v236_v16 }
  0xd0   : > { %v240_v19 = vmul.f32 %v239_v18, %v237_v17 }
  0xd2   : > { %v241_v20 = vxor.u32 2147483648, %v240_v19 }
  0xd4   : > { %v242_v22 = vsel %vm159_vm7, %v241_v20, %v240_v19 }
  0xd5   : > { %v245_v23 = vsel %vm158_vm8, %v550_v6, %v242_v22 }
  0xd6   : > { %402 = vcosq.f32 %v245_v23 }
  0xd7   : > { %404 = vsinq.f32 %v245_v23 }
  0xe3   : > { %v403_v28 = vpop.eup %402 }
  0xe4   : > { %v405_v29 = vpop.eup %404  ;;  %v257_v30 = vxor.u32 2147483648, %v403_v28 }
  0xe5   : > { %v254_v31 = vxor.u32 2147483648, %v405_v29 }
  0xe6   : > { %v258_v11 = vsel %vm256_vm9, %v257_v30, %v405_v29 }
  0xe7   : > { %v255_v32 = vsel %vm253_vm10, %v403_v28, %v254_v31 }
  0xe8   : > { %v259_v33 = vsel %vm252_vm11, %v255_v32, %v258_v11 }
  0xe9   : > { %v260_v34 = vsel %vm249_vm12, nan, %v259_v33 }
  0xea   : > { %261 = vst [vmem:[%s134_s5] sm:$0xff] %v260_v34 }
  0xeb   : > { %419 = shalt.err (!%p416_p3)
}
  0xec   : > { %s420_s23 = scalar_lea.hbm %s576_s14, 128  ;;  %s424_s26 = scalar_lea.hbm %s613_s2, 256 }
  0xed   : > { %p421_p4 = scmp.ne.s32.totalorder %s576_s14, %s420_s23  ;;  %p425_p9 = scmp.lt.s32.totalorder %s576_s14, %s613_s2 }
  0xee   : > { %p426_p10 = scmp.lt.s32.totalorder %s424_s26, %s420_s23 }
  0xef   : > { %p422_p7 = pnand %p421_p4, %p529_p5 }
  0xf0   : > { %p427_p11 = por %p426_p10, %p425_p9 }
  0xf1   : > { %p423_p8 = pneg %p422_p7 }
  0xf3   : > { %p428_p12 = pnand %p427_p11, %p423_p8 }
  0xf5   : > { %431 = shalt.err (!%p428_p12)
}
  0xf6   : > { %355 = dma.vmem_to_hbm [thread:$0]  (%p529_p5), %s277_s6, 128, %s576_s14, %s263_s16  }
  0xf7 PF: > { %p361_p13 = scmp.ge.s32.totalorder %s466_s12, 2  ;;  %s288_s29 = sand.u32 1, %s454_s9  }
  0xf8   : > { %s289_s30 = scalar_lea.sflag [#allocation3], %s288_s29 }
  0xf9   : > { %p358_p0 = pnand %p361_p13, %p533_p6 }
  0xfb   : > { %p359_p1 = pneg %p358_p0 }
  0xfd   : > { %449 = dma.done.wait (%p359_p1), %s289_s30, 128  }
  0xfe   : > { %451 = vsyncadd (%p359_p1), %s289_s30, 4294967168  ;;  %p12_p2 = scmp.ge.s32.totalorder %s516_s15, 4   ;;  %s616_s9 = smov %s458_s10 }
  0xff   : > { %s617_s10 = smov %s462_s11  ;;  %s618_s11 = smov %s527_s18 }
 0x100   : > { %s619_s12 = smov %s516_s15  ;;  %14 = sbr.rel (!%p12_p2) target bundleno = 3 (0x3), region = 63 }
 0x105   :  { %294 = vsyncpa [#allocation3], 1 }
 0x106   :  { %296 = vsyncpa [#allocation3 + $0x1], 1 }

</bundles_post_ra>
